<compile_context>
chip_gen: v7x
topology: tpu7x:2x2x1
jax: 0.10.0
libtpu: 0.0.40
codegen_flags: <defaults>
</compile_context>

<pallas_src>
import functools

import jax
import jax.numpy as jnp
from jax.experimental import pallas as pl
from jax.experimental.pallas import tpu as pltpu


# ---------------------------------------------------------------------------
# Kernels
# ---------------------------------------------------------------------------
def _rln1d_resident_kernel(x_ref, w_ref, b_ref, o_ref, *, eps, inv_n):
    """Whole sample resident in VMEM: exact (centered) mean/var, then FMA."""
    xf = x_ref[...].astype(jnp.float32)                 # (1, T, D)
    mean = jnp.sum(xf) * inv_n
    xc = xf - mean
    var = jnp.sum(xc * xc) * inv_n
    inv_std = jax.lax.rsqrt(var + eps)                  # EUP rsqrt
    scale = w_ref[...].astype(jnp.float32) * inv_std    # (1, 1, D)
    shift = b_ref[...].astype(jnp.float32) - mean * scale
    o_ref[...] = (xf * scale + shift).astype(o_ref.dtype)


def _rln1d_tiled_kernel(x_ref, w_ref, b_ref, o_ref,
                        sum_acc, sq_acc, pilot_sc, scale_sc, shift_sc,
                        *, eps, inv_n, t_rows, ragged):
    """Grid (B, 2, nT): pass 0 = pilot-shifted stats, pass 1 = fused FMA."""
    p = pl.program_id(1)        # 0 = statistics sweep, 1 = normalize sweep
    t = pl.program_id(2)        # T-tile index
    tT = x_ref.shape[1]
    D = x_ref.shape[2]

    @pl.when(jnp.logical_and(p == 0, t == 0))
    def _init():
        # Pilot shift = mean of tile 0 (always a full tile since nT >= 2).
        # Accumulating (x - pilot) keeps the sum-of-squares small so
        # var = E[(x-p)^2] - E[x-p]^2 does not suffer catastrophic
        # cancellation when |mean| >> std.  The pilot is stored splatted
        # across lanes so no scalar VMEM element reads are needed later.
        xf0 = x_ref[...].astype(jnp.float32)
        pilot = jnp.sum(xf0) * (1.0 / float(tT * D))
        pilot_sc[...] = jnp.zeros_like(pilot_sc) + pilot
        sum_acc[...] = jnp.zeros_like(sum_acc)
        sq_acc[...] = jnp.zeros_like(sq_acc)

    @pl.when(p == 0)
    def _stats():
        xf = x_ref[...].astype(jnp.float32)                 # (1, tT, D)
        xc = xf - jnp.expand_dims(pilot_sc[...], 0)         # (1, tT, D)
        if ragged:
            # Last tile may contain padded rows; mask them out of the stats.
            rows = jax.lax.broadcasted_iota(jnp.int32, xc.shape, 1)
            xc = jnp.where(rows < (t_rows - t * tT), xc, 0.0)
        # Regroup sublanes and reduce only over the vreg-row axis (pure VALU
        # adds); the lane/sublane XLU collapse happens once per sample.
        xg = xc.reshape(tT // 8, 8, D)
        sum_acc[...] = sum_acc[...] + jnp.sum(xg, axis=0)
        sq_acc[...] = sq_acc[...] + jnp.sum(xg * xg, axis=0)

    @pl.when(jnp.logical_and(p == 1, t == 0))
    def _finalize_stats():
        s1 = jnp.sum(sum_acc[...]) * inv_n                  # E[x - pilot]
        s2 = jnp.sum(sq_acc[...]) * inv_n                   # E[(x - pilot)^2]
        var = jnp.maximum(s2 - s1 * s1, 0.0)
        inv_std = jax.lax.rsqrt(var + eps)                  # EUP rsqrt
        mean = jnp.expand_dims(pilot_sc[...], 0) + s1       # (1, 1, D), replicated
        scale = w_ref[...].astype(jnp.float32) * inv_std    # (1, 1, D)
        shift = b_ref[...].astype(jnp.float32) - mean * scale
        scale_sc[...] = scale
        shift_sc[...] = shift

    @pl.when(p == 1)
    def _normalize():
        # One multiply + one add per element.
        o_ref[...] = (x_ref[...].astype(jnp.float32) * scale_sc[...]
                      + shift_sc[...]).astype(o_ref.dtype)


# ---------------------------------------------------------------------------
# Wrapper helpers
# ---------------------------------------------------------------------------
def _vmem_capacity_bytes():
    """Physical VMEM per core; conservative 64 MiB fallback (v7x lower bound)."""
    try:
        cap = int(getattr(pltpu.get_tpu_info(), "vmem_capacity_bytes", 0))
        if cap >= (32 << 20):
            return cap
    except Exception:
        pass
    return 64 << 20


def _choose_t_tile(T, D, itemsize, target_bytes, min_rows):
    """Tile rows: multiple of `min_rows`, block <= target_bytes.

    Returns (tile_rows, ragged).  ragged=True means T % tile_rows != 0 and the
    wrapper pads T while the kernel masks the padded rows out of the stats.
    """
    row_bytes = D * itemsize
    budget_rows = max(min_rows,
                      (target_bytes // row_bytes) // min_rows * min_rows)
    if budget_rows >= T:
        return T, False
    # Prefer an exact-divisor tile near the budget (no padded remainder);
    # otherwise take the budget-sized tile and mask the ragged last tile.
    if T % min_rows == 0:
        cand = budget_rows
        floor = max(min_rows, budget_rows // 2)
        while cand >= floor:
            if T % cand == 0:
                return cand, False
            cand -= min_rows
    return budget_rows, True


# ---------------------------------------------------------------------------
# Public entry point
# ---------------------------------------------------------------------------
def rln1d(x, weight, bias, eps=1e-05, max_block_bytes=None):
    """x: (B, T, D); weight, bias broadcastable to (1, 1, D). Returns (B, T, D)."""
    B, T, D = x.shape
    orig_shape = x.shape
    out_dtype = x.dtype
    n_elems = T * D

    w = jnp.reshape(weight, (1, 1, D))
    b = jnp.reshape(bias, (1, 1, D))

    # Lane-dense layout when D < 128: the channel of a flat element depends
    # only on its lane (since 128 % D == 0), so tiling weight/bias to 128
    # lanes is exact and output stores become unmasked full-lane `vst`.
    if D < 128 and 128 % D == 0 and (T * D) % 128 == 0:
        reps = 128 // D
        x = x.reshape(B, (T * D) // 128, 128)
        w = jnp.tile(w, (1, 1, reps))
        b = jnp.tile(b, (1, 1, reps))
    # TODO(synk): repack/pad awkward D (e.g. 96, 192) to a multiple of 128 so
    # those shapes also get unmasked lane-dense stores.
    T2, D2 = x.shape[1], x.shape[2]

    itemsize = x.dtype.itemsize
    vmem_cap = _vmem_capacity_bytes()
    # Live VMEM per block: 2x double-buffered input + 2x output + in-kernel
    # fp32 temporaries (~2 fp32 copies of the block).
    divisor = 4 + 2 * max(1, 4 // itemsize)          # 6 f32, 8 bf16, 12 int8
    block_budget = max((vmem_cap - (8 << 20)) // divisor, 1 << 20)
    if max_block_bytes is not None:
        block_budget = min(block_budget, int(max_block_bytes))

    # Dtype-aware sublane packing minimum: (8,128) f32 / (16,128) bf16 / (32,128) int8.
    min_rows = max(8, 32 // itemsize)
    sample_bytes = T2 * D2 * itemsize
    common = dict(eps=float(eps), inv_n=1.0 / float(n_elems))

    if sample_bytes <= block_budget or T2 < 2 * min_rows:
        # ---- Resident path: whole sample in VMEM, single pass, grid=(B,). ----
        vmem_limit = int(min(vmem_cap - (8 << 20),
                             max(divisor * sample_bytes + (4 << 20), 32 << 20)))
        out = pl.pallas_call(
            functools.partial(_rln1d_resident_kernel, **common),
            out_shape=jax.ShapeDtypeStruct((B, T2, D2), out_dtype),
            grid_spec=pltpu.PrefetchScalarGridSpec(
                num_scalar_prefetch=0,
                grid=(B,),
                in_specs=[
                    pl.BlockSpec((1, T2, D2), lambda bb: (bb, 0, 0)),   # x
                    pl.BlockSpec((1, 1, D2), lambda bb: (0, 0, 0)),     # weight
                    pl.BlockSpec((1, 1, D2), lambda bb: (0, 0, 0)),     # bias
                ],
                out_specs=pl.BlockSpec((1, T2, D2), lambda bb: (bb, 0, 0)),
            ),
            compiler_params=pltpu.CompilerParams(
                dimension_semantics=("parallel",),
                vmem_limit_bytes=vmem_limit),
            cost_estimate=pl.CostEstimate(
                flops=6 * B * n_elems, transcendentals=B,
                bytes_accessed=2 * B * sample_bytes),
        )(x, w, b)
        return out.reshape(orig_shape)

    # ---- Tiled two-pass path: grid=(B, 2, nT). ----
    # TODO(synk): for B < num_tensorcores (e.g. B == 1 on v7x) split the stats
    # pass over T-chunks across cores and combine; currently one core idles.
    tT, ragged = _choose_t_tile(T2, D2, itemsize, block_budget, min_rows)
    nT = pl.cdiv(T2, tT)
    T_pad = nT * tT
    if T_pad != T2:
        x = jnp.pad(x, ((0, 0), (0, T_pad - T2), (0, 0)))

    blk_bytes = tT * D2 * itemsize
    vmem_limit = int(min(vmem_cap - (8 << 20),
                         max(divisor * blk_bytes + (4 << 20), 32 << 20)))

    out = pl.pallas_call(
        functools.partial(_rln1d_tiled_kernel, t_rows=T2, ragged=ragged,
                          **common),
        out_shape=jax.ShapeDtypeStruct((B, T_pad, D2), out_dtype),
        grid_spec=pltpu.PrefetchScalarGridSpec(
            num_scalar_prefetch=0,
            grid=(B, 2, nT),
            in_specs=[
                pl.BlockSpec((1, tT, D2), lambda bb, p, t: (bb, t, 0)),   # x
                pl.BlockSpec((1, 1, D2), lambda bb, p, t: (0, 0, 0)),     # weight
                pl.BlockSpec((1, 1, D2), lambda bb, p, t: (0, 0, 0)),     # bias
            ],
            # During the stats pass (p==0) the output block index is pinned to
            # (bb, 0); that buffer is only flushed after pass 1 writes it, so
            # no uninitialized block is ever written back.  Requires grid order
            # (B, 2, nT) with the pass/tile axes kept sequential ("arbitrary").
            out_specs=pl.BlockSpec((1, tT, D2), lambda bb, p, t: (bb, t * p, 0)),
            scratch_shapes=[
                pltpu.VMEM((8, D2), jnp.float32),     # vreg-shaped partial sums
                pltpu.VMEM((8, D2), jnp.float32),     # vreg-shaped partial sum sq
                pltpu.VMEM((1, D2), jnp.float32),     # pilot shift (lane-splatted)
                pltpu.VMEM((1, 1, D2), jnp.float32),  # scale = w * inv_std
                pltpu.VMEM((1, 1, D2), jnp.float32),  # shift = b - mean * scale
            ],
        ),
        compiler_params=pltpu.CompilerParams(
            dimension_semantics=("parallel", "arbitrary", "arbitrary"),
            vmem_limit_bytes=vmem_limit),
        cost_estimate=pl.CostEstimate(
            flops=7 * B * n_elems, transcendentals=B,
            bytes_accessed=3 * B * sample_bytes),
    )(x, w, b)

    if T_pad != T2:
        out = out[:, :T2, :]
    return out.reshape(orig_shape)


# ---------------------------------------------------------------------------
# Pure-JAX reference mirroring the PyTorch forward
# ---------------------------------------------------------------------------
def rln1d_ref(x, weight, bias, eps=1e-05):
    xf = x.astype(jnp.float32)
    mean = jnp.mean(xf, axis=(1, 2), keepdims=True)
    std = jnp.sqrt(jnp.mean((xf - mean) ** 2, axis=(1, 2), keepdims=True) + eps)
    w = jnp.reshape(weight, (1, 1, -1)).astype(jnp.float32)
    b = jnp.reshape(bias, (1, 1, -1)).astype(jnp.float32)
    return ((xf - mean) / std) * w + b


if __name__ == "__main__":
    key = jax.random.PRNGKey(0)

    def run_case(key, B, T, D, dtype, tol, **kw):
        kx, kwt, kb, key = jax.random.split(key, 4)
        x = jax.random.normal(kx, (B, T, D), dtype=jnp.float32)
        x = (x + 3.0).astype(dtype)   # nonzero mean exercises the centered stats
        weight = jax.random.normal(kwt, (1, 1, D), dtype=jnp.float32)
        bias = jax.random.normal(kb, (1, 1, D), dtype=jnp.float32)
        out = jax.block_until_ready(rln1d(x, weight, bias, **kw))
        ref = rln1d_ref(x, weight, bias)
        assert out.shape == (B, T, D), (out.shape, (B, T, D))
        err = float(jnp.max(jnp.abs(out.astype(jnp.float32) - ref)))
        assert err < tol, f"({B},{T},{D},{dtype}): max abs err {err} >= {tol}"
        return key

    # Resident path with lane-dense repack (D < 128).
    key = run_case(key, 2, 8, 32, jnp.float32, 1e-4)
    # Resident path, D == 128.
    key = run_case(key, 2, 16, 128, jnp.float32, 1e-4)
    # Tiled two-pass path (exact-divisor tiles), forced via a tiny block budget.
    key = run_case(key, 2, 32, 128, jnp.float32, 1e-4,
                   max_block_bytes=8 * 128 * 4)
    # Tiled path with a ragged (padded + masked) last tile.
    key = run_case(key, 2, 36, 128, jnp.float32, 1e-4,
                   max_block_bytes=8 * 128 * 4)
    # Tiled path with bf16 input (16-row sublane packing).
    key = run_case(key, 2, 48, 128, jnp.bfloat16, 1e-1,
                   max_block_bytes=16 * 128 * 2)

    print("KERNEL_OK")
</pallas_src>

<mosaic_0001>
module attributes {stable_mosaic.version = 11 : i64} {
  func.func @_rln1d_resident_kernel(%arg0: i32, %arg1: memref<1x2x128xf32, #tpu.memory_space<vmem>>, %arg2: memref<1x1x128xf32, #tpu.memory_space<vmem>>, %arg3: memref<1x1x128xf32, #tpu.memory_space<vmem>>, %arg4: memref<1x2x128xf32, #tpu.memory_space<vmem>>) attributes {dimension_semantics = [#tpu.dimension_semantics<parallel>], iteration_bounds = array<i64: 2>, scalar_prefetch = 0 : i64, scratch_operands = 0 : i64, tpu.core_type = #tpu.core_type<tc>, window_params = [{transform_indices = @transform_0, window_bounds = array<i64: 1, 2, 128>}, {pipeline_mode = #tpu.pipeline_mode<synchronous>, transform_indices = @transform_1, window_bounds = array<i64: 1, 1, 128>}, {pipeline_mode = #tpu.pipeline_mode<synchronous>, transform_indices = @transform_2, window_bounds = array<i64: 1, 1, 128>}, {transform_indices = @transform_3, window_bounds = array<i64: 1, 2, 128>}]} {
    %c0 = arith.constant 0 : index
    %c0_0 = arith.constant 0 : index
    %c0_1 = arith.constant 0 : index
    %0 = vector.load %arg1[%c0, %c0_0, %c0_1] : memref<1x2x128xf32, #tpu.memory_space<vmem>>, vector<1x2x128xf32>
    %1 = vector.shape_cast %0 : vector<1x2x128xf32> to vector<1x1x2x128xf32>
    %cst = arith.constant dense<0.000000e+00> : vector<1xf32>
    %2 = vector.multi_reduction <add>, %1, %cst [1, 2, 3] : vector<1x1x2x128xf32> to vector<1xf32>
    %3 = vector.shape_cast %2 : vector<1xf32> to vector<1x1x1x1xf32>
    %4 = vector.extract %3[0, 0, 0, 0] : f32 from vector<1x1x1x1xf32>
    %cst_2 = arith.constant 3.906250e-03 : f32
    %5 = arith.mulf %4, %cst_2 : f32
    %6 = vector.broadcast %5 : f32 to vector<1x2x128xf32>
    %7 = arith.subf %0, %6 : vector<1x2x128xf32>
    %8 = arith.mulf %7, %7 : vector<1x2x128xf32>
    %9 = vector.shape_cast %8 : vector<1x2x128xf32> to vector<1x1x2x128xf32>
    %cst_3 = arith.constant dense<0.000000e+00> : vector<1xf32>
    %10 = vector.multi_reduction <add>, %9, %cst_3 [1, 2, 3] : vector<1x1x2x128xf32> to vector<1xf32>
    %11 = vector.shape_cast %10 : vector<1xf32> to vector<1x1x1x1xf32>
    %12 = vector.extract %11[0, 0, 0, 0] : f32 from vector<1x1x1x1xf32>
    %cst_4 = arith.constant 3.906250e-03 : f32
    %13 = arith.mulf %12, %cst_4 : f32
    %cst_5 = arith.constant 9.99999974E-6 : f32
    %14 = arith.addf %13, %cst_5 : f32
    %15 = math.rsqrt %14 : f32
    %c0_6 = arith.constant 0 : index
    %c0_7 = arith.constant 0 : index
    %c0_8 = arith.constant 0 : index
    %16 = vector.load %arg2[%c0_6, %c0_7, %c0_8] : memref<1x1x128xf32, #tpu.memory_space<vmem>>, vector<1x1x128xf32>
    %17 = vector.broadcast %15 : f32 to vector<1x1x128xf32>
    %18 = arith.mulf %16, %17 : vector<1x1x128xf32>
    %c0_9 = arith.constant 0 : index
    %c0_10 = arith.constant 0 : index
    %c0_11 = arith.constant 0 : index
    %19 = vector.load %arg3[%c0_9, %c0_10, %c0_11] : memref<1x1x128xf32, #tpu.memory_space<vmem>>, vector<1x1x128xf32>
    %20 = vector.broadcast %5 : f32 to vector<1x1x128xf32>
    %21 = arith.mulf %20, %18 : vector<1x1x128xf32>
    %22 = arith.subf %19, %21 : vector<1x1x128xf32>
    %23 = vector.broadcast %18 : vector<1x1x128xf32> to vector<1x2x128xf32>
    %24 = arith.mulf %0, %23 : vector<1x2x128xf32>
    %25 = vector.broadcast %22 : vector<1x1x128xf32> to vector<1x2x128xf32>
    %26 = arith.addf %24, %25 : vector<1x2x128xf32>
    %c0_12 = arith.constant 0 : index
    %c0_13 = arith.constant 0 : index
    %c0_14 = arith.constant 0 : index
    %27 = vector.load %arg4[%c0_12, %c0_13, %c0_14] : memref<1x2x128xf32, #tpu.memory_space<vmem>>, vector<1x2x128xf32>
    tpu.vector_store %arg4[%c0_12, %c0_13, %c0_14], %26 {strides = array<i32>} : memref<1x2x128xf32, #tpu.memory_space<vmem>>, vector<1x2x128xf32>,
    return
  }
  func.func @transform_0(%arg0: i32) -> (i32, i32, i32) {
    %c0_i32 = arith.constant 0 : i32
    %c0_i32_0 = arith.constant 0 : i32
    %c0_i32_1 = arith.constant 0 : i32
    return %arg0, %c0_i32, %c0_i32_0 : i32, i32, i32
  }
  func.func @transform_1(%arg0: i32) -> (i32, i32, i32) {
    %c0_i32 = arith.constant 0 : i32
    %c0_i32_0 = arith.constant 0 : i32
    %c0_i32_1 = arith.constant 0 : i32
    %c0_i32_2 = arith.constant 0 : i32
    return %c0_i32, %c0_i32_0, %c0_i32_1 : i32, i32, i32
  }
  func.func @transform_2(%arg0: i32) -> (i32, i32, i32) {
    %c0_i32 = arith.constant 0 : i32
    %c0_i32_0 = arith.constant 0 : i32
    %c0_i32_1 = arith.constant 0 : i32
    %c0_i32_2 = arith.constant 0 : i32
    return %c0_i32, %c0_i32_0, %c0_i32_1 : i32, i32, i32
  }
  func.func @transform_3(%arg0: i32) -> (i32, i32, i32) {
    %c0_i32 = arith.constant 0 : i32
    %c0_i32_0 = arith.constant 0 : i32
    %c0_i32_1 = arith.constant 0 : i32
    return %arg0, %c0_i32, %c0_i32_0 : i32, i32, i32
  }
}

</mosaic_0001>

<bundles_post_ra>
// kernel: tpu_custom_call.1
= control target key start
LH: loop header
LB: loop body
LE: loop exit
PB: predicated region body
PF: predicated region fallthrough
CT: control target
= control target key end

     0   :  { %8 = vsyncpa [#allocation3], 0  ;;  %s681_s0 = inlined_call_operand.hbm [shape: f32[2,2,128], index: 0, kind: input, shape index: {}]   ;;  %s682_s1 = inlined_call_operand.vmem [shape: f32[1,1,128], index: 1, kind: input, shape index: {}]   ;;  %s683_s2 = inlined_call_operand.vmem [shape: f32[1,1,128], index: 2, kind: input, shape index: {}]   ;;  %s684_s3 = inlined_call_operand.hbm [shape: f32[2,2,128], index: 3, kind: output, shape index: {}]  }
   0x1   :  { %10 = vsyncpa [#allocation3 + $0x1], 0 }
   0x2   :  { %11 = vsyncpa [#allocation4], 0 }
   0x3   :  { %13 = vsyncpa [#allocation4 + $0x1], 0  ;;  %s508_s12 = smov 0   ;;  %s510_s13 = smov 0  }
   0x4   :  { %s512_s14 = smov 0   ;;  %s514_s15 = smov 0  }
   0x5 LB: > { %s529_s16 = sadd.s32 4294967295, %s484_s15   ;;  %s322_s17 = sadd.s32 4294967294, %s484_s15   ;;  %s484_s15 = sphi %s514_s15, %s699_s15   ;;  %s480_s14 = sphi %s512_s14, %s698_s14   ;;  %s476_s13 = sphi %s510_s13, %s697_s13   ;;  %s472_s12 = sphi %s508_s12, %s696_s12  }
   0x6   : > { %s533_s18 = sadd.s32 1, %s484_s15   ;;  %s26_s19 = sadd.s32 1, %s480_s14 }
   0x7   : > { %s23_s20 = ssub.s32 %s484_s15, %s533_s18  ;;  %p33_p0 = scmp.ne.s32.totalorder %s480_s14, %s476_s13 }
   0x8   : > { %p24_p1 = scmp.eq.s32.totalorder %s23_s20, 0  ;;  %p34_p2 = scmp.eq.s32.totalorder %s484_s15, 0 }
   0x9   : > { %p39_p3 = scmp.ne.s32.totalorder %s476_s13, %s472_s12  ;;  %p40_p4 = scmp.eq.s32.totalorder %s529_s16, 0 }
   0xa   : > { %s545_s21 = scalar_select %p24_p1, %s480_s14, %s26_s19  }
   0xb   : > { %p547_p5 = por %p34_p2, %p33_p0  ;;  %p551_p6 = por %p40_p4, %p39_p3 }
   0xc   : > { %p105_p7 = scmp.eq.s32.totalorder %s529_s16, 1  ;;  %p111_p8 = scmp.eq.s32.totalorder %s322_s17, 1 }
   0xd   : > { %p352_p10 = scmp.lt.s32.totalorder %s484_s15, 2  ;;  %s137_s26 = sand.u32 1, %s480_s14  }
   0xe   : > { %p558_p11 = por %p105_p7, %p33_p0  ;;  %p562_p12 = por %p111_p8, %p39_p3 }
   0xf   : > { %s326_s27 = sshll.u32 %s484_s15, 5  ;;  %s325_s28 = sshll.u32 %s137_s26, 1 }
  0x10   : > { %s688_s24 = scalar_select %p558_p11, 1, 0 }
  0x11   : > { %s689_s25 = scalar_select %p562_p12, 1, 0 }
  0x12   : > { %s571_s4 = scalar_lea.hbm %s681_s0, %s326_s27  ;;  %s141_s5 = scalar_lea.vmem [#allocation2], %s325_s28 }
  0x13   : > { %s148_s6 = sshll.u32 %s141_s5, 4  ;;  %p575_p13 = pnand %p352_p10, %p547_p5  ;;  %s579_s6 = int_to_ptr.vmem [resolvable:$true] %s148_s6 }
  0x14   : > { %s138_s8 = scalar_lea.sflag [#allocation3], %s137_s26  ;;  %s388_s9 = scalar_lea.hbm %s571_s4, 32 }
  0x15   : > { %p389_p2 = scmp.ne.s32.totalorder %s571_s4, %s388_s9  ;;  %p390_p3 = pneg %p575_p13 }
  0x16   : > { %s393_s17 = scalar_lea.hbm %s681_s0, 64  ;;  %p394_p5 = scmp.lt.u32.totalorder %s571_s4, %s681_s0 }
  0x17   : > { %p391_p4 = pnand %p390_p3, %p389_p2  ;;  %p395_p8 = scmp.lt.u32.totalorder %s393_s17, %s388_s9 }
  0x18   : > { %p397_p9 = scmp.lt.u32.totalorder %s388_s9, %s571_s4 }
  0x19   : > { %p392_p7 = pneg %p391_p4  ;;  %p396_p10 = por %p395_p8, %p394_p5 }
  0x1b   : > { %p398_p0 = por %p397_p9, %p396_p10 }
  0x1d   : > { %p399_p1 = pnand %p398_p0, %p392_p7 }
  0x1f   : > { %402 = shalt.err (!%p399_p1)
}
  0x20   : > { %s403_s22 = scalar_lea.vmem %s579_s6, 32  ;;  %s486_s26 = smov [#allocation2]  }
  0x21   : > { %p404_p2 = scmp.ne.s32.totalorder %s579_s6, %s403_s22  ;;  %s408_s27 = sshll.u32 %s486_s26, 4  ;;  %s409_s27 = int_to_ptr.vmem [resolvable:$false] %s408_s27 }
  0x22   : > { %s410_s28 = scalar_lea.vmem %s409_s27, 64  ;;  %p411_p11 = scmp.lt.s32.totalorder %s579_s6, %s409_s27 }
  0x23   : > { %p406_p4 = pnand %p404_p2, %p390_p3  ;;  %p412_p5 = scmp.lt.s32.totalorder %s410_s28, %s403_s22 }
  0x25   : > { %p407_p12 = pneg %p406_p4  ;;  %p413_p8 = por %p412_p5, %p411_p11 }
  0x27   : > { %p414_p9 = pnand %p413_p8, %p407_p12 }
  0x29   : > { %417 = shalt.err (!%p414_p9)
}
  0x2a   : > { %347 = dma.hbm_to_vmem [thread:$0]  (!%p575_p13), %s571_s4, 32, %s579_s6, %s138_s8  }
  0x2b   : > { %p691_p0 = scmp.lt.s32.totalorder %s484_s15, 3  ;;  %p692_p1 = scmp.ge.s32.totalorder %s484_s15, 1 }
  0x2d   : > { %p154_p3 = pnand %p692_p1, %p691_p0 }
  0x2e   : > { %s613_s29 = sand.u32 (!%p154_p3), 1, %s476_s13  }
  0x2f   : > { %157 = sbr.rel (%p154_p3) target bundleno = 564 (0x234), region = 32  ;;  %s328_s30 = sshll.u32 (!%p154_p3), %s613_s29, 1 }
  0x30   : > { %s160_s5 = scalar_lea.sflag (!%p154_p3), [#allocation3], %s613_s29  ;;  %s163_s7 = scalar_lea.vmem (!%p154_p3), [#allocation2], %s328_s30 }
  0x36   : > { %463 = dma.done.wait (%p551_p6), %s160_s5, 32  }
  0x37   : > { %465 = vsyncadd (%p551_p6), %s160_s5, 4294967264  ;;  %vm187_vm0 = vcmask 1041408   ;;  %v186_v0 = vld [vmem:[%s163_s7] sm:$0x3]  ;;  %v224_v22 = vlaneseq  ;;  %s331_s22 = sshll.u32 %s529_s16, 5  ;;  %s185_s26 = scalar_lea.vmem [#allocation5], %s328_s30 }
  0x38   : > { %v188_v1 = vsel %vm187_vm0, %v186_v0, 0.0  ;;  %v217_v24 = vld [vmem:[%s682_s1] sm:$0x1]  ;;  %s252_s27 = sshll.u32 %s185_s26, 4  ;;  %s637_s7 = scalar_lea.hbm %s684_s3, %s331_s22  ;;  %s639_s27 = int_to_ptr.vmem [resolvable:$true] %s252_s27 }
  0x39   : > { %189 = vadd.xlane.f32.xlu0 %v188_v1  ;;  %v225_v23 = vshrl.u32 %v224_v22, 7  ;;  %v220_v28 = vld [vmem:[%s683_s2] sm:$0x1]  ;;  %p693_p11 = scmp.ne.s32.totalorder %s688_s24, 0  ;;  %s487_s16 = smov [#allocation5]  }
  0x3a   : > { %s422_s30 = sshll.u32 %s487_s16, 4  ;;  %s423_s30 = int_to_ptr.vmem [resolvable:$false] %s422_s30 }
  0x3b   : > { %v226_v25 = vsub.s32 0, %v225_v23  ;;  %p425_p7 = scmp.lt.s32.totalorder %s639_s27, %s423_s30 }
  0xc6   : > { %v190_v2 = vpop.xlane.xlu0 %189 }
  0xc7   : > { %v191_v3 = vrot.slane %v190_v2, 4 }
  0xc9   : > { %v192_v4 = vadd.f32 %v191_v3, %v190_v2 }
  0xcb   : > { %v193_v5 = vrot.slane %v192_v4, 2 }
  0xcd   : > { %v194_v6 = vadd.f32 %v193_v5, %v192_v4 }
  0xcf   : > { %v195_v7 = vrot.slane %v194_v6, 1 }
  0xd1   : > { %v196_v8 = vadd.f32 %v195_v7, %v194_v6 }
  0xd3   : > { %334 = vpush %v196_v8 }
 0x104   : > { %s335_s4 = spop %334 }
 0x105   : > { %s198_s6 = smul.f32 0.00390625, %s335_s4  ;;  %s239_s4 = scalar_lea.sflag [#allocation4], %s613_s29 }
 0x107   : > { %v199_v9 = vstv %s198_s6  ;;  %s418_s6 = scalar_lea.vmem %s639_s27, 32 }
 0x108   : > { %v200_v10 = vsub.f32 %v186_v0, %v199_v9  ;;  %p419_p6 = scmp.ne.s32.totalorder %s639_s27, %s418_s6 }
 0x10a   : > { %v201_v11 = vmul.f32 %v200_v10, %v200_v10  ;;  %p420_p12 = pnand %p419_p6, %p693_p11 }
 0x10c   : > { %v202_v12 = vsel %vm187_vm0, %v201_v11, 0.0  ;;  %p421_p13 = pneg %p420_p12 }
 0x10d   : > { %203 = vadd.xlane.f32.xlu0 %v202_v12 }
 0x19a   : > { %v204_v13 = vpop.xlane.xlu0 %203 }
 0x19b   : > { %v205_v14 = vrot.slane %v204_v13, 4 }
 0x19d   : > { %v206_v15 = vadd.f32 %v205_v14, %v204_v13 }
 0x19f   : > { %v207_v16 = vrot.slane %v206_v15, 2 }
 0x1a1   : > { %v208_v17 = vadd.f32 %v207_v16, %v206_v15 }
 0x1a3   : > { %v209_v18 = vrot.slane %v208_v17, 1 }
 0x1a5   : > { %v210_v19 = vadd.f32 %v209_v18, %v208_v17 }
 0x1a7   : > { %336 = vpush %v210_v19 }
 0x1d8   : > { %s337_s23 = spop %336 }
 0x1d9   : > { %s212_s8 = smul.f32 0.00390625, %s337_s23  ;;  %s424_s23 = scalar_lea.vmem %s423_s30, 64 }
 0x1da   : > { %p426_p10 = scmp.lt.s32.totalorder %s424_s23, %s418_s6 }
 0x1db   : > { %s213_s9 = sadd.f32 1e-05, %s212_s8 }
 0x1dc   : > { %p427_p2 = por %p426_p10, %p425_p7 }
 0x1dd   : > { %v214_v20 = vstv %s213_s9 }
 0x1de   : > { %386 = vrsqrt.f32 %v214_v20  ;;  %p428_p4 = pnand %p427_p2, %p421_p13 }
 0x1e8   : > { %v387_v21 = vpop.eup %386 }
 0x1e9   : > { %338 = vpush %v387_v21 }
 0x21a   : > { %s339_s17 = spop %338 }
 0x21b   : > { %v218_v26 = vstv %s339_s17 }
 0x21c   : > { %v219_v27 = vmul.f32 %v218_v26, %v217_v24 }
 0x21e   : > { %v221_v29 = vmul.f32 %v219_v27, %v199_v9  ;;  %v227_v30 = vrot.slane %v219_v27, %v226_v25 }
 0x220   : > { %v222_v31 = vsub.f32 %v220_v28, %v221_v29  ;;  %v229_v32 = vmul.f32 %v227_v30, %v186_v0 }
 0x222   : > { %v234_v33 = vrot.slane %v222_v31, %v226_v25 }
 0x224   : > { %v236_v34 = vadd.f32 %v234_v33, %v229_v32 }
 0x226   : > { %237 = vst [vmem:[%s185_s26] sm:$0x3] %v236_v34 }
 0x227   : > { %431 = shalt.err (!%p428_p4)
}
 0x228   : > { %s432_s29 = scalar_lea.hbm %s637_s7, 32  ;;  %s436_s10 = scalar_lea.hbm %s684_s3, 64 }
 0x229   : > { %p433_p5 = scmp.ne.s32.totalorder %s637_s7, %s432_s29  ;;  %p437_p0 = scmp.lt.u32.totalorder %s637_s7, %s684_s3 }
 0x22a   : > { %p438_p1 = scmp.lt.u32.totalorder %s436_s10, %s432_s29  ;;  %p440_p6 = scmp.lt.u32.totalorder %s432_s29, %s637_s7 }
 0x22b   : > { %p434_p8 = pnand %p433_p5, %p693_p11 }
 0x22c   : > { %p439_p3 = por %p438_p1, %p437_p0 }
 0x22d   : > { %p435_p9 = pneg %p434_p8 }
 0x22e   : > { %p441_p12 = por %p440_p6, %p439_p3 }
 0x230   : > { %p442_p13 = pnand %p441_p12, %p435_p9 }
 0x232   : > { %445 = shalt.err (!%p442_p13)
}
 0x233   : > { %342 = dma.vmem_to_hbm [thread:$0]  (%p693_p11), %s639_s27, 32, %s637_s7, %s239_s4  }
 0x234 PF: > { %s264_s19 = sand.u32 1, %s472_s12   ;;  %p694_p7 = scmp.ne.s32.totalorder %s689_s25, 0 }
 0x235   : > { %p695_p10 = scmp.ge.s32.totalorder %s484_s15, 2  ;;  %s265_s20 = scalar_lea.sflag [#allocation4], %s264_s19 }
 0x237   : > { %p349_p2 = pnand %p695_p10, %p694_p7 }
 0x239   : > { %467 = dma.done.wait (!%p349_p2), %s265_s20, 32  }
 0x23a   : > { %469 = vsyncadd (!%p349_p2), %s265_s20, 4294967264  ;;  %p16_p4 = scmp.ge.s32.totalorder %s533_s18, 4   ;;  %s696_s12 = smov %s476_s13 }
 0x23b   : > { %s697_s13 = smov %s480_s14  ;;  %s698_s14 = smov %s545_s21 }
 0x23c   : > { %s699_s15 = smov %s533_s18  ;;  %18 = sbr.rel (!%p16_p4) target bundleno = 5 (0x5), region = 77 }
 0x243   :  { %270 = vsyncpa [#allocation3], 1 }
 0x244   :  { %272 = vsyncpa [#allocation3 + $0x1], 1 }
 0x245   :  { %273 = vsyncpa [#allocation4], 1 }
 0x246   :  { %275 = vsyncpa [#allocation4 + $0x1], 1 }

</bundles_post_ra>
